<compile_context>
chip_gen: v5e
topology: v5e:2x2
jax: 0.10.0
libtpu: 0.0.40
codegen_flags: <defaults>
</compile_context>

<pallas_src>
import math

import jax
import jax.numpy as jnp
import numpy as np
from jax.experimental import pallas as pl
from jax.experimental.pallas import tpu as pltpu

LANE = 128


def _odmixta_kernel(x_ref, wfc_ref, bpe_ref, wout_ref, bout_ref, o_ref):
    # x_ref: (TM, N2) row tile covering (batch*time) rows.
    h = jnp.dot(x_ref[...], wfc_ref[...],
                preferred_element_type=jnp.float32) + bpe_ref[...]
    o_ref[...] = jnp.dot(h, wout_ref[...],
                         preferred_element_type=jnp.float32) + bout_ref[...]


def odmixta_forward(x, w_fc, b_fc, pe, w_out, b_out):
    """x: [B, T, N, N] float32. Returns [B, T, N, N] float32."""
    B, T, N, _ = x.shape
    N2 = N * N
    D = w_fc.shape[0]          # d_model (PyTorch weight is (out, in))
    BT = B * T

    # Lane-dense output width (multiple of 128) -> unmasked vector stores.
    N2_pad = max(LANE, ((N2 + LANE - 1) // LANE) * LANE)

    # Collapse batch & time into a single row axis (one slab, not a grid of B
    # tiny steps).
    x_flat = x.reshape(BT, N2)

    # Fold Linear bias + positional encoding into one (BT, D) additive term.
    bias_pe = jnp.tile(b_fc[None, :] + pe, (B, 1))               # (BT, D)

    # Transposed weights so the kernel does plain x @ W; pad the output
    # projection to 128 lanes (padded columns are zero and sliced off below).
    wfc_t = jnp.transpose(w_fc)                                  # (N2, D)
    wout_t = jnp.zeros((D, N2_pad), x.dtype).at[:, :N2].set(jnp.transpose(w_out))
    bout_p = jnp.zeros((1, N2_pad), x.dtype).at[:, :N2].set(b_out[None, :])

    # Row tiling: full slab at small sizes; 256-row tiles (matches the
    # v6e/v7x 256-wide MXU, multiple of v5e's 128) once B*T grows.
    TM = 256 if (BT > 256 and BT % 256 == 0) else BT
    grid = (BT // TM,)

    out_pad = pl.pallas_call(
        _odmixta_kernel,
        out_shape=jax.ShapeDtypeStruct((BT, N2_pad), jnp.float32),
        grid=grid,
        in_specs=[
            pl.BlockSpec((TM, N2), lambda i: (i, 0)),            # x rows
            pl.BlockSpec((N2, D), lambda i: (0, 0)),             # Wfc^T
            pl.BlockSpec((TM, D), lambda i: (i, 0)),             # b_fc + PE
            pl.BlockSpec((D, N2_pad), lambda i: (0, 0)),         # Wout^T (lane-padded)
            pl.BlockSpec((1, N2_pad), lambda i: (0, 0)),         # b_out (lane-padded)
        ],
        out_specs=pl.BlockSpec((TM, N2_pad), lambda i: (i, 0)),
        compiler_params=pltpu.CompilerParams(
            dimension_semantics=("parallel",)),
    )(x_flat, wfc_t, bias_pe, wout_t, bout_p)

    return out_pad[:, :N2].reshape(B, T, N, N)


def make_sinusoidal_pe(seq_len, d_model):
    pos = np.arange(seq_len, dtype=np.float32)[:, None]
    div = np.exp(np.arange(0, d_model, 2, dtype=np.float32)
                 * (-math.log(10000.0) / d_model))
    pe = np.zeros((seq_len, d_model), dtype=np.float32)
    pe[:, 0::2] = np.sin(pos * div)
    pe[:, 1::2] = np.cos(pos * div)
    return jnp.asarray(pe)


def init_linear(key, in_features, out_features):
    """Deterministic nn.Linear-style init: U(-1/sqrt(in), 1/sqrt(in))."""
    kw, kb = jax.random.split(key)
    bound = 1.0 / math.sqrt(in_features)
    w = jax.random.uniform(kw, (out_features, in_features),
                           minval=-bound, maxval=bound, dtype=jnp.float32)
    b = jax.random.uniform(kb, (out_features,),
                           minval=-bound, maxval=bound, dtype=jnp.float32)
    return w, b


if __name__ == "__main__":
    # Small shapes consistent with the module: num_nodes=4, in_seq_len=8,
    # d_model=32, heads=2, num_encoder_layers=2 (encoder layers: see TODO).
    B, T, N, D = 2, 8, 4, 32
    N2 = N * N

    key = jax.random.PRNGKey(0)
    kx, kfc, kout = jax.random.split(key, 3)

    x = jax.random.normal(kx, (B, T, N, N), dtype=jnp.float32)
    w_fc, b_fc = init_linear(kfc, N2, D)      # nn.Linear(N*N, d_model)
    w_out, b_out = init_linear(kout, D, N2)   # nn.Linear(d_model, N*N)
    pe = make_sinusoidal_pe(T, D)

    y = odmixta_forward(x, w_fc, b_fc, pe, w_out, b_out)
    y = jax.block_until_ready(y)

    # Pure-JAX reference for a sanity check.
    h_ref = x.reshape(B, T, N2) @ w_fc.T + b_fc + pe[None]
    y_ref = (h_ref @ w_out.T + b_out).reshape(B, T, N, N)
    assert y.shape == (B, T, N, N)
    np.testing.assert_allclose(np.asarray(y), np.asarray(y_ref),
                               rtol=1e-5, atol=1e-5)

    print("KERNEL_OK")
</pallas_src>

<mosaic_0001>
module attributes {stable_mosaic.version = 11 : i64} {
  func.func @_odmixta_kernel(%arg0: i32, %arg1: memref<16x16xf32, #tpu.memory_space<vmem>>, %arg2: memref<16x32xf32, #tpu.memory_space<vmem>>, %arg3: memref<16x32xf32, #tpu.memory_space<vmem>>, %arg4: memref<32x128xf32, #tpu.memory_space<vmem>>, %arg5: memref<1x128xf32, #tpu.memory_space<vmem>>, %arg6: memref<16x128xf32, #tpu.memory_space<vmem>>) attributes {dimension_semantics = [#tpu.dimension_semantics<parallel>], iteration_bounds = array<i64: 1>, scalar_prefetch = 0 : i64, scratch_operands = 0 : i64, tpu.core_type = #tpu.core_type<tc>, window_params = [{transform_indices = @transform_0, window_bounds = array<i64: 16, 16>}, {pipeline_mode = #tpu.pipeline_mode<synchronous>, transform_indices = @transform_1, window_bounds = array<i64: 16, 32>}, {transform_indices = @transform_2, window_bounds = array<i64: 16, 32>}, {pipeline_mode = #tpu.pipeline_mode<synchronous>, transform_indices = @transform_3, window_bounds = array<i64: 32, 128>}, {pipeline_mode = #tpu.pipeline_mode<synchronous>, transform_indices = @transform_4, window_bounds = array<i64: 1, 128>}, {transform_indices = @transform_5, window_bounds = array<i64: 16, 128>}]} {
    %c0 = arith.constant 0 : index
    %c0_0 = arith.constant 0 : index
    %0 = vector.load %arg1[%c0, %c0_0] : memref<16x16xf32, #tpu.memory_space<vmem>>, vector<16x16xf32>
    %c0_1 = arith.constant 0 : index
    %c0_2 = arith.constant 0 : index
    %1 = vector.load %arg2[%c0_1, %c0_2] : memref<16x32xf32, #tpu.memory_space<vmem>>, vector<16x32xf32>
    %cst = arith.constant dense<0.000000e+00> : vector<16x32xf32>
    %2 = tpu.matmul %0, %1, %cst {dimension_numbers = #tpu.dot_dimension_numbers<[1], [0], [0], [1], [0, 0, 1, 1], [], []>} : vector<16x16xf32>, vector<16x32xf32>, vector<16x32xf32> -> vector<16x32xf32>
    %c0_3 = arith.constant 0 : index
    %c0_4 = arith.constant 0 : index
    %3 = vector.load %arg3[%c0_3, %c0_4] : memref<16x32xf32, #tpu.memory_space<vmem>>, vector<16x32xf32>
    %4 = arith.addf %2, %3 : vector<16x32xf32>
    %c0_5 = arith.constant 0 : index
    %c0_6 = arith.constant 0 : index
    %5 = vector.load %arg4[%c0_5, %c0_6] : memref<32x128xf32, #tpu.memory_space<vmem>>, vector<32x128xf32>
    %cst_7 = arith.constant dense<0.000000e+00> : vector<16x128xf32>
    %6 = tpu.matmul %4, %5, %cst_7 {dimension_numbers = #tpu.dot_dimension_numbers<[1], [0], [0], [1], [0, 0, 1, 1], [], []>} : vector<16x32xf32>, vector<32x128xf32>, vector<16x128xf32> -> vector<16x128xf32>
    %c0_8 = arith.constant 0 : index
    %c0_9 = arith.constant 0 : index
    %7 = vector.load %arg5[%c0_8, %c0_9] : memref<1x128xf32, #tpu.memory_space<vmem>>, vector<1x128xf32>
    %8 = vector.broadcast %7 : vector<1x128xf32> to vector<16x128xf32>
    %9 = arith.addf %6, %8 : vector<16x128xf32>
    %c0_10 = arith.constant 0 : index
    %c0_11 = arith.constant 0 : index
    %10 = vector.load %arg6[%c0_10, %c0_11] : memref<16x128xf32, #tpu.memory_space<vmem>>, vector<16x128xf32>
    tpu.vector_store %arg6[%c0_10, %c0_11], %9 {strides = array<i32>} : memref<16x128xf32, #tpu.memory_space<vmem>>, vector<16x128xf32>,
    return
  }
  func.func @transform_0(%arg0: i32) -> (i32, i32) {
    %c0_i32 = arith.constant 0 : i32
    %c0_i32_0 = arith.constant 0 : i32
    return %arg0, %c0_i32 : i32, i32
  }
  func.func @transform_1(%arg0: i32) -> (i32, i32) {
    %c0_i32 = arith.constant 0 : i32
    %c0_i32_0 = arith.constant 0 : i32
    %c0_i32_1 = arith.constant 0 : i32
    return %c0_i32, %c0_i32_0 : i32, i32
  }
  func.func @transform_2(%arg0: i32) -> (i32, i32) {
    %c0_i32 = arith.constant 0 : i32
    %c0_i32_0 = arith.constant 0 : i32
    return %arg0, %c0_i32 : i32, i32
  }
  func.func @transform_3(%arg0: i32) -> (i32, i32) {
    %c0_i32 = arith.constant 0 : i32
    %c0_i32_0 = arith.constant 0 : i32
    %c0_i32_1 = arith.constant 0 : i32
    return %c0_i32, %c0_i32_0 : i32, i32
  }
  func.func @transform_4(%arg0: i32) -> (i32, i32) {
    %c0_i32 = arith.constant 0 : i32
    %c0_i32_0 = arith.constant 0 : i32
    %c0_i32_1 = arith.constant 0 : i32
    return %c0_i32, %c0_i32_0 : i32, i32
  }
  func.func @transform_5(%arg0: i32) -> (i32, i32) {
    %c0_i32 = arith.constant 0 : i32
    %c0_i32_0 = arith.constant 0 : i32
    return %arg0, %c0_i32 : i32, i32
  }
}

</mosaic_0001>

<bundles_post_ra>
// kernel: tpu_custom_call.1
= control target key start
LH: loop header
LB: loop body
LE: loop exit
PB: predicated region body
PF: predicated region fallthrough
CT: control target
= control target key end

     0   :  { %10 = vsyncpa [#allocation3], 0  ;;  %s397_s0 = inlined_call_operand.hbm [shape: f32[16,16], index: 0, kind: input, shape index: {}]   ;;  %s398_s1 = inlined_call_operand.hbm [shape: f32[16,32], index: 1, kind: input, shape index: {}]   ;;  %s399_s2 = inlined_call_operand.hbm [shape: f32[16,32], index: 2, kind: input, shape index: {}]   ;;  %s400_s3 = inlined_call_operand.hbm [shape: f32[32,128], index: 3, kind: input, shape index: {}]   ;;  %s401_s4 = inlined_call_operand.vmem [shape: f32[1,128], index: 4, kind: input, shape index: {}]   ;;  %s402_s5 = inlined_call_operand.hbm [shape: f32[16,128], index: 5, kind: output, shape index: {}]  }
   0x1   :  { %11 = vsyncpa [#allocation6], 0 }
   0x2   :  { %12 = vsyncpa [#allocation9], 0 }
   0x3   :  { %13 = vsyncpa [#allocation4], 0  ;;  %s31_s20 = sshll.u32 %s398_s1, 4  ;;  %s327_s21 = smov [#allocation5]   ;;  %s32_s20 = int_to_ptr.hbm [resolvable:$true] %s31_s20 }
   0x4   :  { %s33_s22 = sshll.u32 %s327_s21, 4  ;;  %s18_s25 = sshll.u32 %s397_s0, 4  ;;  %s34_s22 = int_to_ptr.vmem [resolvable:$true] %s33_s22  ;;  %s19_s25 = int_to_ptr.hbm [resolvable:$true] %s18_s25 }
   0x5   :  { %s328_s26 = smov 128   ;;  %s329_s27 = smov 8  }
   0x6   :  { %39 = dma.hbm_to_vmem [thread:$0]  %s32_s20, 256, %s34_s22, [#allocation6], %s328_s26, %s328_s26, %s329_s27  }
   0x7   :  { %s330_s28 = smov [#allocation2]   ;;  %s44_s1 = sshll.u32 %s399_s2, 4  ;;  %s45_s1 = int_to_ptr.hbm [resolvable:$true] %s44_s1 }
   0x8   :  { %s20_s29 = sshll.u32 %s330_s28, 4  ;;  %s57_s8 = sshll.u32 %s400_s3, 4  ;;  %s21_s29 = int_to_ptr.vmem [resolvable:$true] %s20_s29  ;;  %s58_s8 = int_to_ptr.hbm [resolvable:$true] %s57_s8 }
   0x9   :  { %26 = dma.hbm_to_vmem [thread:$0]  %s19_s25, 256, %s21_s29, [#allocation3], %s328_s26, %s328_s26, %s329_s27  }
   0xa   :  { %s331_s9 = smov [#allocation7]   ;;  %s332_s11 = smov [#allocation8]  }
   0xb   :  { %s46_s10 = sshll.u32 %s331_s9, 4  ;;  %s59_s2 = sshll.u32 %s332_s11, 4  ;;  %s47_s10 = int_to_ptr.vmem [resolvable:$true] %s46_s10  ;;  %s60_s2 = int_to_ptr.vmem [resolvable:$true] %s59_s2 }
   0xc   :  { %52 = dma.hbm_to_vmem [thread:$0]  %s45_s1, 256, %s47_s10, [#allocation6], %s328_s26, %s328_s26, %s329_s27  }
   0xd   :  { %65 = dma.hbm_to_vmem [thread:$0]  %s58_s8, 512, %s60_s2, [#allocation9], %s328_s26, %s328_s26, %s329_s27  }
   0xe   :  { %319 = dma.done.wait [#allocation3], 256  }
   0xf   :  { %320 = vsyncadd [#allocation3], 4294967040 }
  0x10   :  { %321 = dma.done.wait [#allocation6], 512  }
  0x11   :  { %322 = vsyncadd [#allocation6], 4294966784 }
  0x12   :  { %323 = dma.done.wait [#allocation9], 512  }
  0x13   :  { %324 = vsyncadd [#allocation9], 4294966784  ;;  %v87_v0 = vld [vmem:[#allocation5 + $0x8] sm:$0xff]  ;;  %v86_v1 = vld [vmem:[#allocation5] sm:$0xff]  ;;  %vm90_vm0 = vcmask 130048   ;;  %vm128_vm1 = vcmask 261120  }
  0x14   :  { %185 = vmatpush.msra.mxu3 %v87_v0  ;;  %v85_v2 = vld [vmem:[#allocation2 + $0x8] sm:$0xff]  ;;  %111 = vmatpush.msra.mxu0 %v87_v0  ;;  %v84_v3 = vld [vmem:[#allocation2] sm:$0xff]  ;;  %v121_v6 = vld [vmem:[#allocation8 + $0x8] sm:$0xff]  ;;  %s333_s13 = smov [#allocation10]   ;;  %s166_s17 = sshll.u32 %s402_s5, 4  ;;  %s167_s17 = int_to_ptr.hbm [resolvable:$true] %s166_s17 }
  0x15   :  { %v123_v4 = vld [vmem:[#allocation8 + $0x18] sm:$0xff]  ;;  %v122_v5 = vld [vmem:[#allocation8 + $0x10] sm:$0xff]  ;;  %v120_v7 = vld [vmem:[#allocation8] sm:$0xff]  ;;  %s164_s14 = sshll.u32 %s333_s13, 4  ;;  %s165_s14 = int_to_ptr.vmem [resolvable:$true] %s164_s14 }
  0x16   :  { %187 = vmatpush.msra.mxu2 %v123_v4  ;;  %147 = vmatpush.msra.mxu1 %v123_v4  ;;  %v88_v8 = vld [vmem:[#allocation7] sm:$0xff]  ;;  %v89_v11 = vld [vmem:[#allocation7 + $0x8] sm:$0xff] }
  0x17   :  { %186 = vmatpush.msra.mxu3 %v86_v1  ;;  %112 = vmatpush.msra.mxu0 %v86_v1  ;;  %v198_v14 = vld [vmem:[%s401_s4] ss:$0 sm:$0xff] }
  0x18   :  { %182 = vmatmul.msk.f32.vlgmr.msra.gmra.mxu3 %vm90_vm0, %v85_v2  ;;  %181 = vmatmul.msk.f32.vlgmr.msra.gmra.mxu0 %vm90_vm0, %v84_v3 }
  0x19   :  { %188 = vmatpush.msra.mxu2 %v122_v5  ;;  %148 = vmatpush.msra.mxu1 %v122_v5 }
  0x1b   :  { %189 = vmatpush.msra.mxu2 %v121_v6  ;;  %149 = vmatpush.msra.mxu1 %v121_v6 }
  0x1d   :  { %190 = vmatpush.msra.mxu2 %v120_v7  ;;  %150 = vmatpush.msra.mxu1 %v120_v7 }
  0x95   :  { %v114_v9 = vpop.f32.mrf.mxu0 }
  0x96   :  { %v115_v10 = vadd.f32 %v114_v9, %v88_v8 }
  0x98   :  { %183 = vmatmul.msk.f32.vlgmr.msra.gmra.mxu1 %vm128_vm1, %v115_v10 }
  0x9b   :  { %v117_v12 = vpop.f32.mrf.mxu3 }
  0x9c   :  { %v118_v13 = vadd.f32 %v117_v12, %v89_v11 }
  0x9e   :  { %184 = vmatmul.msk.f32.vlgmr.msra.gmra.mxu2 %vm128_vm1, %v118_v13 }
 0x115   :  { %v152_v15 = vpop.f32.mrf.mxu1 }
 0x116   :  { %v153_v16 = vadd.f32 %v198_v14, %v152_v15 }
 0x118   :  { %158 = vst [vmem:[#allocation10] sm:$0xff] %v153_v16 }
 0x121   :  { %v155_v17 = vpop.f32.mrf.mxu2 }
 0x122   :  { %v156_v18 = vadd.f32 %v198_v14, %v155_v17 }
 0x124   :  { %159 = vst [vmem:[#allocation10 + $0x8] sm:$0xff] %v156_v18 }
 0x125   :  { %172 = dma.vmem_to_hbm [thread:$0]  %s165_s14, 256, %s167_s17, [#allocation4], %s328_s26, %s328_s26, %s329_s27  }
 0x126   :  { %325 = dma.done.wait [#allocation4], 256  }
 0x127   :  { %326 = vsyncadd [#allocation4], 4294967040 }
 0x128   :  { %177 = vsyncpa [#allocation3], 1 }
 0x129   :  { %178 = vsyncpa [#allocation6], 1 }
 0x12a   :  { %179 = vsyncpa [#allocation9], 1 }
 0x12b   :  { %180 = vsyncpa [#allocation4], 1 }

</bundles_post_ra>
